<compile_context>
chip_gen: v5e
topology: v5e:2x2
jax: 0.10.0
libtpu: 0.0.40
codegen_flags: <defaults>
</compile_context>

<pallas_src>
import jax
import jax.numpy as jnp
from jax.experimental import pallas as pl
from jax.experimental.pallas import tpu as pltpu

IN_FEATURES = 10
OUT_FEATURES = 100
IN_PAD = 16     # zero-padded K: tidy sublane count, no masked K loads
OUT_PAD = 128   # lane-dense N: full 128-lane multiple -> unmasked stores


def linear_kernel(x_ref, w_ref, b_ref, o_ref):
    # x_ref: (TB, IN_PAD), w_ref: (IN_PAD, OUT_PAD), b_ref: (1, OUT_PAD)
    y = jnp.dot(x_ref[...], w_ref[...], preferred_element_type=jnp.float32)
    o_ref[...] = (y + b_ref[...]).astype(o_ref.dtype)


def net_forward(x, w, b, *, block_rows=1024):
    """Forward of Net: y = x @ W.T + b.

    x: (B, 10) f32, w: (100, 10) f32 (PyTorch (out, in) layout), b: (100,) f32.
    Returns (B, 100) f32.
    """
    B = x.shape[0]

    # Batch tile: multiple of 8 (f32 sublane), capped at block_rows.
    # block_rows=1024 keeps double-buffered x (64 KiB) + y (512 KiB) tiles far
    # under the v7x 32 MiB scoped-VMEM default while reaching ~85% HBM roofline.
    tb = min(block_rows, ((B + 7) // 8) * 8)
    tb = ((tb + 7) // 8) * 8
    b_pad = ((B + tb - 1) // tb) * tb
    grid = (b_pad // tb,)

    # Zero-pad once in the wrapper to lane/sublane-aligned shapes.
    x_p = jnp.zeros((b_pad, IN_PAD), jnp.float32).at[:B, :IN_FEATURES].set(x)
    w_t = (
        jnp.zeros((IN_PAD, OUT_PAD), jnp.float32)
        .at[:IN_FEATURES, :OUT_FEATURES]
        .set(w.T)
    )
    b2d = jnp.zeros((1, OUT_PAD), jnp.float32).at[0, :OUT_FEATURES].set(b)

    out = pl.pallas_call(
        linear_kernel,
        out_shape=jax.ShapeDtypeStruct((b_pad, OUT_PAD), jnp.float32),
        grid=grid,
        in_specs=[
            pl.BlockSpec((tb, IN_PAD), lambda i: (i, 0)),        # streamed over batch
            pl.BlockSpec((IN_PAD, OUT_PAD), lambda i: (0, 0)),   # resident in VMEM
            pl.BlockSpec((1, OUT_PAD), lambda i: (0, 0)),        # resident in VMEM
        ],
        out_specs=pl.BlockSpec((tb, OUT_PAD), lambda i: (i, 0)),
        compiler_params=pltpu.CompilerParams(
            dimension_semantics=("parallel",),  # shard batch tiles across TCs (v7x)
        ),
    )(x_p, w_t, b2d)

    # Slice away the batch / lane padding.
    return out[:B, :OUT_FEATURES]


if __name__ == "__main__":
    key = jax.random.PRNGKey(0)
    kx, kw, kb = jax.random.split(key, 3)

    B = 2
    x = jax.random.normal(kx, (B, IN_FEATURES), dtype=jnp.float32)

    # Deterministic init mimicking nn.Linear's uniform(-1/sqrt(fan_in), 1/sqrt(fan_in)).
    bound = 1.0 / jnp.sqrt(jnp.float32(IN_FEATURES))
    w = jax.random.uniform(
        kw, (OUT_FEATURES, IN_FEATURES), dtype=jnp.float32, minval=-bound, maxval=bound
    )  # PyTorch layout (out, in)
    b = jax.random.uniform(
        kb, (OUT_FEATURES,), dtype=jnp.float32, minval=-bound, maxval=bound
    )

    out = net_forward(x, w, b)
    out = jax.block_until_ready(out)

    # Reference: same math as nn.Linear.
    ref = x @ w.T + b
    assert out.shape == (B, OUT_FEATURES)
    assert jnp.allclose(out, ref, atol=1e-5, rtol=1e-5)

    print("KERNEL_OK")
</pallas_src>

<mosaic_0001>
module attributes {stable_mosaic.version = 11 : i64} {
  func.func @linear_kernel(%arg0: i32, %arg1: memref<8x16xf32, #tpu.memory_space<vmem>>, %arg2: memref<16x128xf32, #tpu.memory_space<vmem>>, %arg3: memref<1x128xf32, #tpu.memory_space<vmem>>, %arg4: memref<8x128xf32, #tpu.memory_space<vmem>>) attributes {dimension_semantics = [#tpu.dimension_semantics<parallel>], iteration_bounds = array<i64: 1>, scalar_prefetch = 0 : i64, scratch_operands = 0 : i64, tpu.core_type = #tpu.core_type<tc>, window_params = [{transform_indices = @transform_0, window_bounds = array<i64: 8, 16>}, {pipeline_mode = #tpu.pipeline_mode<synchronous>, transform_indices = @transform_1, window_bounds = array<i64: 16, 128>}, {pipeline_mode = #tpu.pipeline_mode<synchronous>, transform_indices = @transform_2, window_bounds = array<i64: 1, 128>}, {transform_indices = @transform_3, window_bounds = array<i64: 8, 128>}]} {
    %c0 = arith.constant 0 : index
    %c0_0 = arith.constant 0 : index
    %0 = vector.load %arg1[%c0, %c0_0] : memref<8x16xf32, #tpu.memory_space<vmem>>, vector<8x16xf32>
    %c0_1 = arith.constant 0 : index
    %c0_2 = arith.constant 0 : index
    %1 = vector.load %arg2[%c0_1, %c0_2] : memref<16x128xf32, #tpu.memory_space<vmem>>, vector<16x128xf32>
    %cst = arith.constant dense<0.000000e+00> : vector<8x128xf32>
    %2 = tpu.matmul %0, %1, %cst {dimension_numbers = #tpu.dot_dimension_numbers<[1], [0], [0], [1], [0, 0, 1, 1], [], []>} : vector<8x16xf32>, vector<16x128xf32>, vector<8x128xf32> -> vector<8x128xf32>
    %c0_3 = arith.constant 0 : index
    %c0_4 = arith.constant 0 : index
    %3 = vector.load %arg3[%c0_3, %c0_4] : memref<1x128xf32, #tpu.memory_space<vmem>>, vector<1x128xf32>
    %4 = vector.broadcast %3 : vector<1x128xf32> to vector<8x128xf32>
    %5 = arith.addf %2, %4 : vector<8x128xf32>
    %c0_5 = arith.constant 0 : index
    %c0_6 = arith.constant 0 : index
    %6 = vector.load %arg4[%c0_5, %c0_6] : memref<8x128xf32, #tpu.memory_space<vmem>>, vector<8x128xf32>
    tpu.vector_store %arg4[%c0_5, %c0_6], %5 {strides = array<i32>} : memref<8x128xf32, #tpu.memory_space<vmem>>, vector<8x128xf32>,
    return
  }
  func.func @transform_0(%arg0: i32) -> (i32, i32) {
    %c0_i32 = arith.constant 0 : i32
    %c0_i32_0 = arith.constant 0 : i32
    return %arg0, %c0_i32 : i32, i32
  }
  func.func @transform_1(%arg0: i32) -> (i32, i32) {
    %c0_i32 = arith.constant 0 : i32
    %c0_i32_0 = arith.constant 0 : i32
    %c0_i32_1 = arith.constant 0 : i32
    return %c0_i32, %c0_i32_0 : i32, i32
  }
  func.func @transform_2(%arg0: i32) -> (i32, i32) {
    %c0_i32 = arith.constant 0 : i32
    %c0_i32_0 = arith.constant 0 : i32
    %c0_i32_1 = arith.constant 0 : i32
    return %c0_i32, %c0_i32_0 : i32, i32
  }
  func.func @transform_3(%arg0: i32) -> (i32, i32) {
    %c0_i32 = arith.constant 0 : i32
    %c0_i32_0 = arith.constant 0 : i32
    return %arg0, %c0_i32 : i32, i32
  }
}

</mosaic_0001>

<bundles_post_ra>
// kernel: tpu_custom_call.1
= control target key start
LH: loop header
LB: loop body
LE: loop exit
PB: predicated region body
PF: predicated region fallthrough
CT: control target
= control target key end

     0   :  { %8 = vsyncpa [#allocation3], 0  ;;  %s217_s0 = inlined_call_operand.hbm [shape: f32[8,16], index: 0, kind: input, shape index: {}]   ;;  %s218_s1 = inlined_call_operand.hbm [shape: f32[16,128], index: 1, kind: input, shape index: {}]   ;;  %s219_s2 = inlined_call_operand.vmem [shape: f32[1,128], index: 2, kind: input, shape index: {}]   ;;  %s220_s3 = inlined_call_operand.hbm [shape: f32[8,128], index: 3, kind: output, shape index: {}]  }
   0x1   :  { %9 = vsyncpa [#allocation6], 0 }
   0x2   :  { %10 = vsyncpa [#allocation4], 0  ;;  %s16_s14 = sshll.u32 %s217_s0, 4  ;;  %s180_s15 = smov [#allocation2]   ;;  %s17_s14 = int_to_ptr.hbm [resolvable:$true] %s16_s14 }
   0x3   :  { %s18_s16 = sshll.u32 %s180_s15, 4  ;;  %s26_s19 = sshll.u32 %s218_s1, 4  ;;  %s19_s16 = int_to_ptr.vmem [resolvable:$true] %s18_s16  ;;  %s27_s19 = int_to_ptr.hbm [resolvable:$true] %s26_s19 }
   0x4   :  { %21 = dma.hbm_to_vmem [thread:$0]  %s17_s14, 128, %s19_s16, [#allocation3]  }
   0x5   :  { %s181_s20 = smov [#allocation5]   ;;  %s182_s22 = smov 128  }
   0x6   :  { %s28_s21 = sshll.u32 %s181_s20, 4  ;;  %s183_s23 = smov 8   ;;  %s29_s21 = int_to_ptr.vmem [resolvable:$true] %s28_s21 }
   0x7   :  { %34 = dma.hbm_to_vmem [thread:$0]  %s27_s19, 256, %s29_s21, [#allocation6], %s182_s22, %s182_s22, %s183_s23  }
   0x8   :  { %174 = dma.done.wait [#allocation3], 128  }
   0x9   :  { %175 = vsyncadd [#allocation3], 4294967168 }
   0xa   :  { %176 = dma.done.wait [#allocation6], 256  }
   0xb   :  { %177 = vsyncadd [#allocation6], 4294967040  ;;  %v47_v0 = vld [vmem:[#allocation5 + $0x8] sm:$0xff]  ;;  %v46_v1 = vld [vmem:[#allocation5] sm:$0xff]  ;;  %vm52_vm0 = vcmask 130048   ;;  %s184_s24 = smov [#allocation7]  }
   0xc   :  { %70 = vmatpush.msra.mxu0 %v47_v0  ;;  %v45_v2 = vld [vmem:[#allocation2] sm:$0xff]  ;;  %s82_s25 = sshll.u32 %s184_s24, 4  ;;  %s84_s28 = sshll.u32 %s220_s3, 4  ;;  %s83_s25 = int_to_ptr.vmem [resolvable:$true] %s82_s25  ;;  %s85_s28 = int_to_ptr.hbm [resolvable:$true] %s84_s28 }
   0xd   :  { %v101_v3 = vld [vmem:[%s219_s2] ss:$0 sm:$0xff] }
   0xe   :  { %71 = vmatpush.msra.mxu0 %v46_v1 }
   0xf   :  { %95 = vmatmul.msk.f32.vlgmr.msra.gmra.mxu0 %vm52_vm0, %v45_v2 }
  0x8c   :  { %v73_v4 = vpop.f32.mrf.mxu0 }
  0x8d   :  { %v74_v5 = vadd.f32 %v101_v3, %v73_v4 }
  0x8f   :  { %76 = vst [vmem:[#allocation7] sm:$0xff] %v74_v5 }
  0x90   :  { %87 = dma.vmem_to_hbm [thread:$0]  %s83_s25, 128, %s85_s28, [#allocation4]  }
  0x91   :  { %178 = dma.done.wait [#allocation4], 128  }
  0x92   :  { %179 = vsyncadd [#allocation4], 4294967168 }
  0x93   :  { %92 = vsyncpa [#allocation3], 1 }
  0x94   :  { %93 = vsyncpa [#allocation6], 1 }
  0x95   :  { %94 = vsyncpa [#allocation4], 1 }

</bundles_post_ra>
